<compile_context>
chip_gen: v5e
topology: v5e:2x2
jax: 0.10.0
libtpu: 0.0.40
codegen_flags: <defaults>
</compile_context>

<pallas_src>
import functools

import jax
import jax.numpy as jnp
from jax.experimental import pallas as pl
from jax.experimental.pallas import tpu as pltpu

BN_EPS = 1e-5
LANE = 128


def _round_up(x, m):
    return ((x + m - 1) // m) * m


# ---------------- fused single-call path (small / moderate N) ----------------
def _fused_kernel(x_ref, w1_ref, gamma_ref, beta_ref, w2_ref, b2_ref, o_ref,
                  *, n_true, inv_n):
    # x_ref: (in_pad, n_pad) transposed, lane-dense.  Row `in_dim` of x is all-ones for
    # valid columns (bias augmentation); the matching W1 row is zero so it is inert here.
    h = jax.lax.dot_general(x_ref[...], w1_ref[...],
                            (((0,), (0,)), ((), ())),
                            preferred_element_type=jnp.float32)          # (n_pad, h_pad)
    # Batch statistics over the TRUE batch rows.  Padded rows of h are exactly zero, so
    # they contribute nothing to the sum; the centered second moment is explicitly masked
    # (avoids the E[h^2]-E[h]^2 cancellation issue flagged in review).
    mean = jnp.sum(h, axis=0, keepdims=True) * inv_n
    row = jax.lax.broadcasted_iota(jnp.int32, h.shape, 0)
    hc = jnp.where(row < n_true, h - mean, 0.0)
    var = jnp.sum(hc * hc, axis=0, keepdims=True) * inv_n                # biased (training BN)
    scale = gamma_ref[...] * jax.lax.rsqrt(var + BN_EPS)
    shift = beta_ref[...] - mean * scale
    h = jnp.maximum(h * scale + shift, 0.0)
    out = jnp.dot(h.astype(w2_ref.dtype), w2_ref[...],
                  preferred_element_type=jnp.float32) + b2_ref[...]
    o_ref[...] = out.astype(o_ref.dtype)


# ---------------- two-pass path, pass 1: bias-augmented Gram of x ----------------
def _gram_kernel(x_ref, gram_ref):
    # x_ref: (in_pad, bn) block of bias-augmented x^T.  Accumulate G = x_aug x_aug^T:
    #   G[:d, :d] = x^T x,   G[d, :d] = column sums of x,   G[d, d] = N      (d = in_dim)
    @pl.when(pl.program_id(1) == 0)
    def _init():
        gram_ref[...] = jnp.zeros_like(gram_ref)

    xt = x_ref[...]
    g = jax.lax.dot_general(xt, xt, (((1,), (1,)), ((), ())),            # trans_b matmul
                            preferred_element_type=jnp.float32)
    gram_ref[...] += g[jnp.newaxis]


# ---------------- two-pass path, pass 2: folded BN + ReLU + second Linear ----------------
def _apply_kernel(x_ref, w1_ref, scale_ref, shift_ref, w2_ref, b2_ref, o_ref):
    h = jax.lax.dot_general(x_ref[...], w1_ref[...],                     # trans_a matmul
                            (((0,), (0,)), ((), ())),
                            preferred_element_type=jnp.float32)          # (bn, h_pad)
    h = jnp.maximum(h * scale_ref[...] + shift_ref[...], 0.0)            # folded BN + ReLU
    out = jnp.dot(h.astype(w2_ref.dtype), w2_ref[...],
                  preferred_element_type=jnp.float32) + b2_ref[...]
    o_ref[...] = out.astype(o_ref.dtype)


def mlp_forward(x, params, *, block_n=4096, matmul_dtype=jnp.float32,
                out_dtype=jnp.float32, fuse_max_rows=4096, stats_cores=2):
    """Forward pass of the 2-layer MLP.

    x: (N, input_dim) f32.  params: dict with w1 (in,hid), w2 (hid,out), b1/b2/gamma/beta.
    matmul_dtype: jnp.bfloat16 is the fast MXU path on ALL generations (v5e/v6e/v7x have
      bf16-native MXUs); jnp.float32 (default) is reference-exact.  BN/ReLU math is f32.
    out_dtype: dtype of the kernel's HBM output stream (bf16 halves writeback bytes).
    block_n: batch rows per grid step on the large-N path (2048-4096 on v7x, up to 8192
      on v5e/v6e is fine -- VMEM is nowhere near binding with the lane-dense x layout).
    fuse_max_rows: N at or below this uses the single fused kernel.
    stats_cores: leading parallel axis of the stats pass (2 -> both TCs on v7x).
    """
    N, in_dim = x.shape
    H = params["w1"].shape[1]
    out_dim = params["w2"].shape[1]

    xd = jnp.dtype(matmul_dtype)
    pack = 16 if xd.itemsize == 2 else 8            # sublane packing of matmul dtype
    in_pad = _round_up(in_dim + 1, pack)            # +1: ones row (bias / Gram augmentation)
    h_pad = _round_up(H, LANE)                      # lane-dense hidden
    out_pad = _round_up(out_dim, LANE)              # lane-dense, unmasked output stores
    ones_row = in_dim

    use_fused = N <= fuse_max_rows
    if use_fused:
        n_pad = _round_up(N, LANE)
    else:
        bn = _round_up(max(LANE, min(block_n, _round_up(N, LANE))), LANE)
        blocks_per_core = pl.cdiv(pl.cdiv(N, bn), stats_cores)
        n_steps = stats_cores * blocks_per_core
        n_pad = bn * n_steps

    # --- one-time layout in the wrapper: transposed, bias-augmented, zero-padded ---
    x_t = jnp.zeros((in_pad, n_pad), xd)
    x_t = x_t.at[:in_dim, :N].set(x.T.astype(xd))
    x_t = x_t.at[ones_row, :N].set(jnp.ones((N,), xd))   # ones ONLY for true batch cols
    w1_p = jnp.zeros((in_pad, h_pad), xd).at[:in_dim, :H].set(params["w1"].astype(xd))
    w2_p = jnp.zeros((h_pad, out_pad), xd).at[:H, :out_dim].set(params["w2"].astype(xd))
    b2_p = jnp.zeros((1, out_pad), jnp.float32).at[:, :out_dim].set(params["b2"])
    gamma_p = jnp.zeros((1, h_pad), jnp.float32).at[:, :H].set(params["gamma"])
    beta_p = jnp.zeros((1, h_pad), jnp.float32).at[:, :H].set(params["beta"])

    itemsize = xd.itemsize
    out_itemsize = jnp.dtype(out_dtype).itemsize
    vmem_limit = 32 * 1024 * 1024   # explicit; safe on v7x's 64 MiB physical VMEM

    # ---------------- fused single-kernel path ----------------
    if use_fused:
        flops = 2 * n_pad * h_pad * (in_pad + out_pad) + 8 * n_pad * h_pad
        bytes_acc = ((n_pad * in_pad + in_pad * h_pad + h_pad * out_pad) * itemsize
                     + (2 * h_pad + out_pad) * 4 + n_pad * out_pad * out_itemsize)
        out_p = pl.pallas_call(
            functools.partial(_fused_kernel, n_true=N, inv_n=1.0 / N),
            out_shape=jax.ShapeDtypeStruct((n_pad, out_pad), out_dtype),
            grid=(1,),
            in_specs=[
                pl.BlockSpec((in_pad, n_pad), lambda i: (0, 0)),
                pl.BlockSpec((in_pad, h_pad), lambda i: (0, 0)),
                pl.BlockSpec((1, h_pad), lambda i: (0, 0)),
                pl.BlockSpec((1, h_pad), lambda i: (0, 0)),
                pl.BlockSpec((h_pad, out_pad), lambda i: (0, 0)),
                pl.BlockSpec((1, out_pad), lambda i: (0, 0)),
            ],
            out_specs=pl.BlockSpec((n_pad, out_pad), lambda i: (0, 0)),
            compiler_params=pltpu.CompilerParams(
                dimension_semantics=("arbitrary",),
                vmem_limit_bytes=vmem_limit),
            cost_estimate=pl.CostEstimate(flops=flops, transcendentals=h_pad,
                                          bytes_accessed=bytes_acc),
        )(x_t, w1_p, gamma_p, beta_p, w2_p, b2_p)
        return out_p[:N, :out_dim]

    # ---------------- pass 1: partial Grams (2-way parallel leading axis) ----------------
    gram_flops = 2 * n_pad * in_pad * in_pad
    gram_bytes = n_pad * in_pad * itemsize + stats_cores * in_pad * in_pad * 4
    gram_parts = pl.pallas_call(
        _gram_kernel,
        out_shape=jax.ShapeDtypeStruct((stats_cores, in_pad, in_pad), jnp.float32),
        grid=(stats_cores, blocks_per_core),
        in_specs=[pl.BlockSpec((in_pad, bn),
                               lambda c, i: (0, c * blocks_per_core + i))],
        out_specs=pl.BlockSpec((1, in_pad, in_pad), lambda c, i: (c, 0, 0)),
        compiler_params=pltpu.CompilerParams(
            dimension_semantics=("parallel", "arbitrary"),
            vmem_limit_bytes=vmem_limit),
        cost_estimate=pl.CostEstimate(flops=gram_flops, transcendentals=0,
                                      bytes_accessed=gram_bytes),
    )(x_t)

    # Tiny wrapper math: sufficient statistics -> folded scale/shift.
    # Zero-padded batch columns contribute nothing; divide by the TRUE N.
    gram = jnp.sum(gram_parts, axis=0)                                   # (in_pad, in_pad)
    w1_f = w1_p.astype(jnp.float32)                                      # same rounding as MXU inputs
    sum_h = gram[ones_row:ones_row + 1, :] @ w1_f                        # colsum(x) @ W1 -> (1, h_pad)
    sumsq_h = jnp.sum(w1_f * (gram @ w1_f), axis=0, keepdims=True)       # diag(W1^T G W1)
    inv_n = 1.0 / N
    mean = sum_h * inv_n
    # TODO(synk): uncentered E[h^2]-E[h]^2 is cancellation-prone if |mean| >> std.
    var = jnp.maximum(sumsq_h * inv_n - mean * mean, 0.0)                # biased var (training BN)
    scale = gamma_p * jax.lax.rsqrt(var + BN_EPS)
    shift = beta_p - mean * scale

    # ---------------- pass 2: normalize + ReLU + second Linear ----------------
    apply_flops = 2 * n_pad * h_pad * (in_pad + out_pad) + 4 * n_pad * h_pad
    apply_bytes = ((n_pad * in_pad + in_pad * h_pad + h_pad * out_pad) * itemsize
                   + n_pad * out_pad * out_itemsize + (2 * h_pad + out_pad) * 4)
    out_p = pl.pallas_call(
        _apply_kernel,
        out_shape=jax.ShapeDtypeStruct((n_pad, out_pad), out_dtype),
        grid=(n_steps,),
        in_specs=[
            pl.BlockSpec((in_pad, bn), lambda i: (0, i)),
            pl.BlockSpec((in_pad, h_pad), lambda i: (0, 0)),
            pl.BlockSpec((1, h_pad), lambda i: (0, 0)),
            pl.BlockSpec((1, h_pad), lambda i: (0, 0)),
            pl.BlockSpec((h_pad, out_pad), lambda i: (0, 0)),
            pl.BlockSpec((1, out_pad), lambda i: (0, 0)),
        ],
        out_specs=pl.BlockSpec((bn, out_pad), lambda i: (i, 0)),
        compiler_params=pltpu.CompilerParams(
            dimension_semantics=("parallel",),        # both TCs on v7x; no-op on v5e/v6e
            vmem_limit_bytes=vmem_limit),
        cost_estimate=pl.CostEstimate(flops=apply_flops, transcendentals=0,
                                      bytes_accessed=apply_bytes),
    )(x_t, w1_p, scale, shift, w2_p, b2_p)
    return out_p[:N, :out_dim]


def init_params(key, input_dim, hidden_dim, output_dim):
    """Deterministic init mimicking nn.Linear (U(-1/sqrt(fan_in), +1/sqrt(fan_in)))
    and nn.BatchNorm1d (gamma=1, beta=0). Linear weights stored pre-transposed (in, out)."""
    k1, k2, k3, k4 = jax.random.split(key, 4)
    bnd1 = 1.0 / jnp.sqrt(input_dim)
    bnd2 = 1.0 / jnp.sqrt(hidden_dim)
    return {
        "w1": jax.random.uniform(k1, (input_dim, hidden_dim), jnp.float32, -bnd1, bnd1),
        "b1": jax.random.uniform(k2, (1, hidden_dim), jnp.float32, -bnd1, bnd1),
        "gamma": jnp.ones((1, hidden_dim), jnp.float32),
        "beta": jnp.zeros((1, hidden_dim), jnp.float32),
        "w2": jax.random.uniform(k3, (hidden_dim, output_dim), jnp.float32, -bnd2, bnd2),
        "b2": jax.random.uniform(k4, (1, output_dim), jnp.float32, -bnd2, bnd2),
    }


def mlp_reference(x, params):
    """Pure-JAX reference matching the PyTorch forward (b1 included; BN cancels it)."""
    h = x @ params["w1"] + params["b1"]
    mean = jnp.mean(h, axis=0, keepdims=True)
    var = jnp.mean((h - mean) ** 2, axis=0, keepdims=True)
    h = (h - mean) / jnp.sqrt(var + BN_EPS) * params["gamma"] + params["beta"]
    h = jnp.maximum(h, 0.0)
    return h @ params["w2"] + params["b2"]


if __name__ == "__main__":
    # MLP(num_layers=2, input_dim=7, hidden_dim=64, output_dim=64)
    num_layers, input_dim, hidden_dim, output_dim = 2, 7, 64, 64
    batch = 8

    key = jax.random.PRNGKey(0)
    kx, kp, kx2 = jax.random.split(key, 3)
    x = jax.random.normal(kx, (batch, input_dim), jnp.float32)
    params = init_params(kp, input_dim, hidden_dim, output_dim)
    ref = mlp_reference(x, params)

    # Small-N fused path, f32 matmuls (reference-exact up to fp rounding; the b1 drop is exact).
    out = jax.block_until_ready(mlp_forward(x, params))
    assert out.shape == (batch, output_dim)
    assert jnp.allclose(out, ref, atol=1e-4, rtol=1e-4), "fused f32 kernel mismatch vs reference"

    # Small-N fused path, bf16 MXU inputs (fast MXU path on v5e/v6e/v7x), f32 accumulation.
    out_bf16 = jax.block_until_ready(mlp_forward(x, params, matmul_dtype=jnp.bfloat16))
    assert out_bf16.shape == (batch, output_dim)
    assert jnp.allclose(out_bf16, ref, atol=1e-1, rtol=1e-1), "fused bf16 kernel mismatch vs reference"

    # Larger, non-block-divisible batch forcing the two-pass path (Gram stats with the
    # 2-way parallel core axis + apply pass), with small block_n so the grid has >1 step.
    batch2 = 300
    x2 = jax.random.normal(kx2, (batch2, input_dim), jnp.float32)
    ref2 = mlp_reference(x2, params)
    out2 = jax.block_until_ready(
        mlp_forward(x2, params, block_n=128, fuse_max_rows=0))
    assert out2.shape == (batch2, output_dim)
    assert jnp.allclose(out2, ref2, atol=2e-3, rtol=2e-3), "two-pass kernel mismatch vs reference"

    print("KERNEL_OK")
</pallas_src>

<mosaic_0001>
module attributes {stable_mosaic.version = 11 : i64} {
  func.func @_fused_kernel(%arg0: i32, %arg1: memref<8x128xf32, #tpu.memory_space<vmem>>, %arg2: memref<8x128xf32, #tpu.memory_space<vmem>>, %arg3: memref<1x128xf32, #tpu.memory_space<vmem>>, %arg4: memref<1x128xf32, #tpu.memory_space<vmem>>, %arg5: memref<128x128xf32, #tpu.memory_space<vmem>>, %arg6: memref<1x128xf32, #tpu.memory_space<vmem>>, %arg7: memref<128x128xf32, #tpu.memory_space<vmem>>) attributes {dimension_semantics = [#tpu.dimension_semantics<arbitrary>], iteration_bounds = array<i64: 1>, scalar_prefetch = 0 : i64, scratch_operands = 0 : i64, tpu.core_type = #tpu.core_type<tc>, window_params = [{pipeline_mode = #tpu.pipeline_mode<synchronous>, transform_indices = @transform_0, window_bounds = array<i64: 8, 128>}, {pipeline_mode = #tpu.pipeline_mode<synchronous>, transform_indices = @transform_1, window_bounds = array<i64: 8, 128>}, {pipeline_mode = #tpu.pipeline_mode<synchronous>, transform_indices = @transform_2, window_bounds = array<i64: 1, 128>}, {pipeline_mode = #tpu.pipeline_mode<synchronous>, transform_indices = @transform_3, window_bounds = array<i64: 1, 128>}, {pipeline_mode = #tpu.pipeline_mode<synchronous>, transform_indices = @transform_4, window_bounds = array<i64: 128, 128>}, {pipeline_mode = #tpu.pipeline_mode<synchronous>, transform_indices = @transform_5, window_bounds = array<i64: 1, 128>}, {pipeline_mode = #tpu.pipeline_mode<synchronous>, transform_indices = @transform_6, window_bounds = array<i64: 128, 128>}]} {
    %c0 = arith.constant 0 : index
    %c0_0 = arith.constant 0 : index
    %0 = vector.load %arg1[%c0, %c0_0] : memref<8x128xf32, #tpu.memory_space<vmem>>, vector<8x128xf32>
    %c0_1 = arith.constant 0 : index
    %c0_2 = arith.constant 0 : index
    %1 = vector.load %arg2[%c0_1, %c0_2] : memref<8x128xf32, #tpu.memory_space<vmem>>, vector<8x128xf32>
    %cst = arith.constant dense<0.000000e+00> : vector<128x128xf32>
    %2 = tpu.matmul %0, %1, %cst {dimension_numbers = #tpu.dot_dimension_numbers<[0], [0], [1], [1], [0, 1, 1, 1], [], []>} : vector<8x128xf32>, vector<8x128xf32>, vector<128x128xf32> -> vector<128x128xf32>
    %cst_3 = arith.constant dense<0.000000e+00> : vector<128xf32>
    %3 = vector.multi_reduction <add>, %2, %cst_3 [0] : vector<128x128xf32> to vector<128xf32>
    %4 = vector.shape_cast %3 : vector<128xf32> to vector<1x128xf32>
    %cst_4 = arith.constant 1.250000e-01 : f32
    %5 = vector.broadcast %cst_4 : f32 to vector<1x128xf32>
    %6 = arith.mulf %4, %5 : vector<1x128xf32>
    %7 = tpu.iota {dimensions = array<i32: 0>} : vector<128x128xi32>
    %c8_i32 = arith.constant 8 : i32
    %8 = vector.broadcast %c8_i32 : i32 to vector<128x128xi32>
    %9 = arith.cmpi slt, %7, %8 : vector<128x128xi32>
    %10 = vector.broadcast %6 : vector<1x128xf32> to vector<128x128xf32>
    %11 = arith.subf %2, %10 : vector<128x128xf32>
    %cst_5 = arith.constant 0.000000e+00 : f32
    %12 = vector.broadcast %cst_5 : f32 to vector<128x128xf32>
    %13 = arith.select %9, %11, %12 : vector<128x128xi1>, vector<128x128xf32>
    %14 = arith.mulf %13, %13 : vector<128x128xf32>
    %cst_6 = arith.constant dense<0.000000e+00> : vector<128xf32>
    %15 = vector.multi_reduction <add>, %14, %cst_6 [0] : vector<128x128xf32> to vector<128xf32>
    %16 = vector.shape_cast %15 : vector<128xf32> to vector<1x128xf32>
    %cst_7 = arith.constant 1.250000e-01 : f32
    %17 = vector.broadcast %cst_7 : f32 to vector<1x128xf32>
    %18 = arith.mulf %16, %17 : vector<1x128xf32>
    %c0_8 = arith.constant 0 : index
    %c0_9 = arith.constant 0 : index
    %19 = vector.load %arg3[%c0_8, %c0_9] : memref<1x128xf32, #tpu.memory_space<vmem>>, vector<1x128xf32>
    %cst_10 = arith.constant 9.99999974E-6 : f32
    %20 = vector.broadcast %cst_10 : f32 to vector<1x128xf32>
    %21 = arith.addf %18, %20 : vector<1x128xf32>
    %22 = math.rsqrt %21 : vector<1x128xf32>
    %23 = arith.mulf %19, %22 : vector<1x128xf32>
    %c0_11 = arith.constant 0 : index
    %c0_12 = arith.constant 0 : index
    %24 = vector.load %arg4[%c0_11, %c0_12] : memref<1x128xf32, #tpu.memory_space<vmem>>, vector<1x128xf32>
    %25 = arith.mulf %6, %23 : vector<1x128xf32>
    %26 = arith.subf %24, %25 : vector<1x128xf32>
    %27 = vector.broadcast %23 : vector<1x128xf32> to vector<128x128xf32>
    %28 = arith.mulf %2, %27 : vector<128x128xf32>
    %29 = vector.broadcast %26 : vector<1x128xf32> to vector<128x128xf32>
    %30 = arith.addf %28, %29 : vector<128x128xf32>
    %cst_13 = arith.constant 0.000000e+00 : f32
    %31 = vector.broadcast %cst_13 : f32 to vector<128x128xf32>
    %32 = arith.maximumf %30, %31 : vector<128x128xf32>
    %c0_14 = arith.constant 0 : index
    %c0_15 = arith.constant 0 : index
    %33 = vector.load %arg5[%c0_14, %c0_15] : memref<128x128xf32, #tpu.memory_space<vmem>>, vector<128x128xf32>
    %cst_16 = arith.constant dense<0.000000e+00> : vector<128x128xf32>
    %34 = tpu.matmul %32, %33, %cst_16 {dimension_numbers = #tpu.dot_dimension_numbers<[1], [0], [0], [1], [0, 0, 1, 1], [], []>} : vector<128x128xf32>, vector<128x128xf32>, vector<128x128xf32> -> vector<128x128xf32>
    %c0_17 = arith.constant 0 : index
    %c0_18 = arith.constant 0 : index
    %35 = vector.load %arg6[%c0_17, %c0_18] : memref<1x128xf32, #tpu.memory_space<vmem>>, vector<1x128xf32>
    %36 = vector.broadcast %35 : vector<1x128xf32> to vector<128x128xf32>
    %37 = arith.addf %34, %36 : vector<128x128xf32>
    %c0_19 = arith.constant 0 : index
    %c0_20 = arith.constant 0 : index
    %38 = vector.load %arg7[%c0_19, %c0_20] : memref<128x128xf32, #tpu.memory_space<vmem>>, vector<128x128xf32>
    tpu.vector_store %arg7[%c0_19, %c0_20], %37 {strides = array<i32>} : memref<128x128xf32, #tpu.memory_space<vmem>>, vector<128x128xf32>,
    return
  }
  func.func @transform_0(%arg0: i32) -> (i32, i32) {
    %c0_i32 = arith.constant 0 : i32
    %c0_i32_0 = arith.constant 0 : i32
    %c0_i32_1 = arith.constant 0 : i32
    return %c0_i32, %c0_i32_0 : i32, i32
  }
  func.func @transform_1(%arg0: i32) -> (i32, i32) {
    %c0_i32 = arith.constant 0 : i32
    %c0_i32_0 = arith.constant 0 : i32
    %c0_i32_1 = arith.constant 0 : i32
    return %c0_i32, %c0_i32_0 : i32, i32
  }
  func.func @transform_2(%arg0: i32) -> (i32, i32) {
    %c0_i32 = arith.constant 0 : i32
    %c0_i32_0 = arith.constant 0 : i32
    %c0_i32_1 = arith.constant 0 : i32
    return %c0_i32, %c0_i32_0 : i32, i32
  }
  func.func @transform_3(%arg0: i32) -> (i32, i32) {
    %c0_i32 = arith.constant 0 : i32
    %c0_i32_0 = arith.constant 0 : i32
    %c0_i32_1 = arith.constant 0 : i32
    return %c0_i32, %c0_i32_0 : i32, i32
  }
  func.func @transform_4(%arg0: i32) -> (i32, i32) {
    %c0_i32 = arith.constant 0 : i32
    %c0_i32_0 = arith.constant 0 : i32
    %c0_i32_1 = arith.constant 0 : i32
    return %c0_i32, %c0_i32_0 : i32, i32
  }
  func.func @transform_5(%arg0: i32) -> (i32, i32) {
    %c0_i32 = arith.constant 0 : i32
    %c0_i32_0 = arith.constant 0 : i32
    %c0_i32_1 = arith.constant 0 : i32
    return %c0_i32, %c0_i32_0 : i32, i32
  }
  func.func @transform_6(%arg0: i32) -> (i32, i32) {
    %c0_i32 = arith.constant 0 : i32
    %c0_i32_0 = arith.constant 0 : i32
    %c0_i32_1 = arith.constant 0 : i32
    return %c0_i32, %c0_i32_0 : i32, i32
  }
}

</mosaic_0001>

<bundles_post_ra>
// kernel: tpu_custom_call.1
= control target key start
LH: loop header
LB: loop body
LE: loop exit
PB: predicated region body
PF: predicated region fallthrough
CT: control target
= control target key end

     0   :  { %11 = vsyncpa [#allocation3], 0  ;;  %s863_s0 = inlined_call_operand.hbm [shape: f32[8,128], index: 0, kind: input, shape index: {}]   ;;  %s864_s1 = inlined_call_operand.hbm [shape: f32[8,128], index: 1, kind: input, shape index: {}]   ;;  %s865_s2 = inlined_call_operand.vmem [shape: f32[1,128], index: 2, kind: input, shape index: {}]   ;;  %s866_s3 = inlined_call_operand.vmem [shape: f32[1,128], index: 3, kind: input, shape index: {}]   ;;  %s867_s4 = inlined_call_operand.hbm [shape: f32[128,128], index: 4, kind: input, shape index: {}]   ;;  %s868_s5 = inlined_call_operand.vmem [shape: f32[1,128], index: 5, kind: input, shape index: {}]   ;;  %s869_s6 = inlined_call_operand.hbm [shape: f32[128,128], index: 6, kind: output, shape index: {}]  }
   0x1   :  { %12 = vsyncpa [#allocation6], 0  ;;  %s30_s23 = sshll.u32 %s864_s1, 4  ;;  %s31_s23 = int_to_ptr.hbm [resolvable:$true] %s30_s23 }
   0x2   :  { %13 = vsyncpa [#allocation4], 0  ;;  %s692_s24 = smov [#allocation5]   ;;  %s19_s28 = sshll.u32 %s863_s0, 4  ;;  %s20_s28 = int_to_ptr.hbm [resolvable:$true] %s19_s28 }
   0x3   :  { %s32_s25 = sshll.u32 %s692_s24, 4  ;;  %s693_s29 = smov [#allocation2]   ;;  %s33_s25 = int_to_ptr.vmem [resolvable:$true] %s32_s25 }
   0x4   :  { %35 = dma.hbm_to_vmem [thread:$0]  %s31_s23, 128, %s33_s25, [#allocation6]  }
   0x5   :  { %s21_s30 = sshll.u32 %s693_s29, 4  ;;  %s44_s9 = sshll.u32 %s867_s4, 4  ;;  %s22_s30 = int_to_ptr.vmem [resolvable:$true] %s21_s30  ;;  %s45_s9 = int_to_ptr.hbm [resolvable:$true] %s44_s9 }
   0x6   :  { %24 = dma.hbm_to_vmem [thread:$0]  %s20_s28, 128, %s22_s30, [#allocation3]  }
   0x7   :  { %s694_s1 = smov [#allocation7]   ;;  %s695_s11 = smov 128  }
   0x8   :  { %s46_s10 = sshll.u32 %s694_s1, 4  ;;  %s696_s12 = smov 8   ;;  %s47_s10 = int_to_ptr.vmem [resolvable:$true] %s46_s10 }
   0x9   :  { %52 = dma.hbm_to_vmem [thread:$0]  %s45_s9, 2048, %s47_s10, [#allocation6], %s695_s11, %s695_s11, %s696_s12  }
   0xa   :  { %686 = dma.done.wait [#allocation3], 128  }
   0xb   :  { %687 = vsyncadd [#allocation3], 4294967168 }
   0xc   :  { %688 = dma.done.wait [#allocation6], 2176  }
   0xd   :  { %689 = vsyncadd [#allocation6], 4294965120  ;;  %v67_v0 = vld [vmem:[#allocation2] sm:$0xff]  ;;  %v68_v1 = vld [vmem:[#allocation5] sm:$0xff]  ;;  %vm101_vm0 = vcmask 64512   ;;  %s517_s18 = sshll.u32 %s869_s6, 4  ;;  %s518_s18 = int_to_ptr.hbm [resolvable:$true] %s517_s18 }
   0xe   :  { %69 = vxpose.xlu0.b32.start.end [1/1] (short) %v67_v0, 128  ;;  %165 = vmatpush.msra.mxu0 %v68_v1  ;;  %v425_v50 = vld [vmem:[#allocation7 + $0x78] sm:$0xff]  ;;  %v424_v52 = vld [vmem:[#allocation7 + $0x70] sm:$0xff]  ;;  %v423_v54 = vld [vmem:[#allocation7 + $0x68] sm:$0xff] }
   0xf   :  { %547 = vmatpush.msra.mxu3 %v68_v1  ;;  %430 = vmatpush.msra.mxu1 %v425_v50  ;;  %v422_v56 = vld [vmem:[#allocation7 + $0x60] sm:$0xff]  ;;  %v421_v58 = vld [vmem:[#allocation7 + $0x58] sm:$0xff]  ;;  %v420_v60 = vld [vmem:[#allocation7 + $0x50] sm:$0xff] }
  0x10   :  { %548 = vmatpush.msra.mxu2 %v425_v50  ;;  %v419_v62 = vld [vmem:[#allocation7 + $0x48] sm:$0xff]  ;;  %v418_v0 = vld [vmem:[#allocation7 + $0x40] sm:$0xff] }
  0x11   :  { %549 = vmatpush.msrb.mxu3 %v425_v50  ;;  %431 = vmatpush.msra.mxu1 %v424_v52 }
  0x12   :  { %550 = vmatpush.msra.mxu2 %v424_v52 }
  0x13   :  { %551 = vmatpush.msrb.mxu3 %v424_v52  ;;  %432 = vmatpush.msra.mxu1 %v423_v54 }
  0x14   :  { %552 = vmatpush.msra.mxu2 %v423_v54 }
  0x15   :  { %553 = vmatpush.msrb.mxu3 %v423_v54  ;;  %433 = vmatpush.msra.mxu1 %v422_v56 }
  0x16   :  { %554 = vmatpush.msra.mxu2 %v422_v56 }
  0x17   :  { %555 = vmatpush.msrb.mxu3 %v422_v56  ;;  %434 = vmatpush.msra.mxu1 %v421_v58 }
  0x18   :  { %556 = vmatpush.msra.mxu2 %v421_v58 }
  0x19   :  { %557 = vmatpush.msrb.mxu3 %v421_v58  ;;  %435 = vmatpush.msra.mxu1 %v420_v60 }
  0x1a   :  { %558 = vmatpush.msra.mxu2 %v420_v60 }
  0x1b   :  { %559 = vmatpush.msrb.mxu3 %v420_v60  ;;  %436 = vmatpush.msra.mxu1 %v419_v62 }
  0x1c   :  { %560 = vmatpush.msra.mxu2 %v419_v62 }
  0x1d   :  { %561 = vmatpush.msrb.mxu3 %v419_v62  ;;  %437 = vmatpush.msra.mxu1 %v418_v0 }
  0x1e   :  { %562 = vmatpush.msra.mxu2 %v418_v0 }
  0x1f   :  { %563 = vmatpush.msrb.mxu3 %v418_v0 }
  0xb2   :  { %v85_v2 = vpop.trf.xlu0 }
  0xb3   :  { %531 = vmatmul.msk.f32.vlgmr.msra.gmra.mxu0 %vm101_vm0, %v85_v2  ;;  %v417_v2 = vld [vmem:[#allocation7 + $0x38] sm:$0xff] }
  0xb4   :  { %438 = vmatpush.msra.mxu1 %v417_v2  ;;  %564 = vmatpush.msra.mxu2 %v417_v2 }
  0xb5   :  { %565 = vmatpush.msrb.mxu3 %v417_v2 }
  0xba   :  { %v86_v3 = vpop.trf.xlu0 }
  0xbb   :  { %532 = vmatmul.msk.f32.gmra.mxu0 %vm101_vm0, %v86_v3 }
  0xc2   :  { %v87_v4 = vpop.trf.xlu0 }
  0xc3   :  { %533 = vmatmul.msk.f32.gmra.mxu0 %vm101_vm0, %v87_v4  ;;  %v416_v4 = vld [vmem:[#allocation7 + $0x30] sm:$0xff] }
  0xc4   :  { %439 = vmatpush.msra.mxu1 %v416_v4  ;;  %566 = vmatpush.msra.mxu2 %v416_v4 }
  0xc5   :  { %567 = vmatpush.msrb.mxu3 %v416_v4 }
  0xca   :  { %v88_v5 = vpop.trf.xlu0 }
  0xcb   :  { %534 = vmatmul.msk.f32.gmra.mxu0 %vm101_vm0, %v88_v5 }
  0xd2   :  { %v89_v6 = vpop.trf.xlu0 }
  0xd3   :  { %535 = vmatmul.msk.f32.gmra.mxu0 %vm101_vm0, %v89_v6  ;;  %v415_v6 = vld [vmem:[#allocation7 + $0x28] sm:$0xff] }
  0xd4   :  { %440 = vmatpush.msra.mxu1 %v415_v6  ;;  %568 = vmatpush.msra.mxu2 %v415_v6 }
  0xd5   :  { %569 = vmatpush.msrb.mxu3 %v415_v6 }
  0xda   :  { %v90_v7 = vpop.trf.xlu0 }
  0xdb   :  { %536 = vmatmul.msk.f32.gmra.mxu0 %vm101_vm0, %v90_v7 }
  0xe2   :  { %v91_v8 = vpop.trf.xlu0 }
  0xe3   :  { %537 = vmatmul.msk.f32.gmra.mxu0 %vm101_vm0, %v91_v8  ;;  %v414_v8 = vld [vmem:[#allocation7 + $0x20] sm:$0xff] }
  0xe4   :  { %441 = vmatpush.msra.mxu1 %v414_v8  ;;  %570 = vmatpush.msra.mxu2 %v414_v8 }
  0xe5   :  { %571 = vmatpush.msrb.mxu3 %v414_v8 }
  0xea   :  { %v92_v9 = vpop.trf.xlu0 }
  0xeb   :  { %538 = vmatmul.msk.f32.gmra.mxu0 %vm101_vm0, %v92_v9 }
  0xf2   :  { %v93_v10 = vpop.trf.xlu0 }
  0xf3   :  { %539 = vmatmul.msk.f32.gmra.mxu0 %vm101_vm0, %v93_v10  ;;  %v413_v10 = vld [vmem:[#allocation7 + $0x18] sm:$0xff] }
  0xf4   :  { %442 = vmatpush.msra.mxu1 %v413_v10  ;;  %572 = vmatpush.msra.mxu2 %v413_v10 }
  0xf5   :  { %573 = vmatpush.msrb.mxu3 %v413_v10 }
  0xfa   :  { %v94_v11 = vpop.trf.xlu0 }
  0xfb   :  { %540 = vmatmul.msk.f32.gmra.mxu0 %vm101_vm0, %v94_v11 }
 0x102   :  { %v95_v12 = vpop.trf.xlu0 }
 0x103   :  { %541 = vmatmul.msk.f32.vlgmr.msra.gmra.mxu3 %vm101_vm0, %v95_v12  ;;  %v412_v12 = vld [vmem:[#allocation7 + $0x10] sm:$0xff] }
 0x104   :  { %443 = vmatpush.msra.mxu1 %v412_v12  ;;  %574 = vmatpush.msra.mxu2 %v412_v12 }
 0x105   :  { %575 = vmatpush.msrb.mxu3 %v412_v12 }
 0x10a   :  { %v96_v13 = vpop.trf.xlu0 }
 0x10b   :  { %542 = vmatmul.msk.f32.gmra.mxu3 %vm101_vm0, %v96_v13  ;;  %v411_v13 = vld [vmem:[#allocation7 + $0x8] sm:$0xff] }
 0x10c   :  { %444 = vmatpush.msra.mxu1 %v411_v13  ;;  %576 = vmatpush.msra.mxu2 %v411_v13 }
 0x10d   :  { %577 = vmatpush.msrb.mxu3 %v411_v13 }
 0x112   :  { %v97_v14 = vpop.trf.xlu0 }
 0x113   :  { %543 = vmatmul.msk.f32.gmra.mxu3 %vm101_vm0, %v97_v14 }
 0x11a   :  { %v98_v15 = vpop.trf.xlu0 }
 0x11b   :  { %544 = vmatmul.msk.f32.gmra.mxu3 %vm101_vm0, %v98_v15  ;;  %v410_v15 = vld [vmem:[#allocation7] sm:$0xff] }
 0x11c   :  { %445 = vmatpush.msra.mxu1 %v410_v15  ;;  %578 = vmatpush.msra.mxu2 %v410_v15 }
 0x11d   :  { %579 = vmatpush.msrb.mxu3 %v410_v15 }
 0x122   :  { %v99_v16 = vpop.trf.xlu0 }
 0x123   :  { %545 = vmatmul.msk.f32.gmra.mxu3 %vm101_vm0, %v99_v16 }
 0x12a   :  { %v100_v17 = vpop.trf.xlu0 }
 0x12b   :  { %546 = vmatmul.msk.f32.gmra.mxu3 %vm101_vm0, %v100_v17 }
 0x130   :  { %v761_v18 = vpop.f32.mrf.mxu0 }
 0x138   :  { %v763_v19 = vpop.f32.mrf.mxu0 }
 0x139   :  { %v215_v28 = vadd.f32 %v763_v19, %v761_v18 }
 0x140   :  { %v765_v20 = vpop.f32.mrf.mxu0 }
 0x141   :  { %v216_v29 = vadd.f32 %v215_v28, %v765_v20 }
 0x148   :  { %v767_v21 = vpop.f32.mrf.mxu0 }
 0x149   :  { %v217_v32 = vadd.f32 %v216_v29, %v767_v21 }
 0x150   :  { %v769_v22 = vpop.f32.mrf.mxu0 }
 0x151   :  { %v218_v33 = vadd.f32 %v217_v32, %v769_v22 }
 0x158   :  { %v771_v23 = vpop.f32.mrf.mxu0 }
 0x159   :  { %v219_v34 = vadd.f32 %v218_v33, %v771_v23 }
 0x160   :  { %v773_v24 = vpop.f32.mrf.mxu0 }
 0x161   :  { %v220_v35 = vadd.f32 %v219_v34, %v773_v24 }
 0x168   :  { %v777_v26 = vpop.f32.mrf.mxu0 }
 0x169   :  { %v221_v37 = vadd.f32 %v220_v35, %v777_v26  ;;  %v340_v35 = vld [vmem:[%s865_s2] sm:$0x1] }
 0x170   :  { %v784_v30 = vpop.f32.mrf.mxu0 }
 0x171   :  { %v222_v39 = vadd.f32 %v221_v37, %v784_v30 }
 0x178   :  { %v795_v38 = vpop.f32.mrf.mxu0 }
 0x179   :  { %v223_v40 = vadd.f32 %v222_v39, %v795_v38 }
 0x186   :  { %v775_v25 = vpop.f32.mrf.mxu3 }
 0x187   :  { %v224_v41 = vadd.f32 %v223_v40, %v775_v25 }
 0x18e   :  { %v779_v27 = vpop.f32.mrf.mxu3 }
 0x18f   :  { %v225_v43 = vadd.f32 %v224_v41, %v779_v27  ;;  %v353_v41 = vld [vmem:[%s866_s3] sm:$0x1] }
 0x196   :  { %v786_v31 = vpop.f32.mrf.mxu3 }
 0x197   :  { %v226_v44 = vadd.f32 %v225_v43, %v786_v31 }
 0x19e   :  { %v792_v36 = vpop.f32.mrf.mxu3 }
 0x19f   :  { %v227_v45 = vadd.f32 %v226_v44, %v792_v36 }
 0x1a6   :  { %v800_v42 = vpop.f32.mrf.mxu3 }
 0x1a7   :  { %v228_v46 = vadd.f32 %v227_v45, %v800_v42 }
 0x1ae   :  { %v806_v47 = vpop.f32.mrf.mxu3 }
 0x1af   :  { %v229_v48 = vadd.f32 %v228_v46, %v806_v47 }
 0x1b1   :  { %v230_v49 = vrot.slane %v229_v48, 4 }
 0x1b3   :  { %v231_v51 = vadd.f32 %v230_v49, %v229_v48 }
 0x1b5   :  { %v232_v53 = vrot.slane %v231_v51, 2 }
 0x1b7   :  { %v233_v55 = vadd.f32 %v232_v53, %v231_v51 }
 0x1b9   :  { %v234_v57 = vrot.slane %v233_v55, 1 }
 0x1bb   :  { %v235_v59 = vadd.f32 %v234_v57, %v233_v55 }
 0x1bd   :  { %v809_v61 = vmul.f32 0.125, %v235_v59 }
 0x1bf   :  { %v270_v63 = vsub.f32 %v761_v18, %v809_v61 }
 0x1c1   :  { %v302_v1 = vmul.f32 %v270_v63, %v270_v63 }
 0x1c3   :  { %v333_v3 = vrot.slane %v302_v1, 4 }
 0x1c5   :  { %v334_v5 = vadd.f32 %v333_v3, %v302_v1 }
 0x1c7   :  { %v335_v7 = vrot.slane %v334_v5, 2 }
 0x1c9   :  { %v336_v9 = vadd.f32 %v335_v7, %v334_v5 }
 0x1cb   :  { %v337_v11 = vrot.slane %v336_v9, 1 }
 0x1cd   :  { %v338_v14 = vadd.f32 %v337_v11, %v336_v9 }
 0x1cf   :  { %v339_v16 = vmul.f32 0.125, %v338_v14 }
 0x1d1   :  { %v341_v17 = vadd.f32 1e-05, %v339_v16 }
 0x1d3   :  { %588 = vrsqrt.f32 %v341_v17  ;;  %vm348_vm2 = vweird.f32 %v341_v17 }
 0x1d9   :  { %v589_v28 = vpop.eup %588 }
 0x1da   :  { %v343_v29 = vmul.f32 %v589_v28, %v341_v17  ;;  %vm349_vm1 = vweird.f32 %v589_v28 }
 0x1db   :  { %vm350_vm3 = vmor %vm348_vm2, %vm349_vm1 }
 0x1dc   :  { %v344_v32 = vmul.f32 %v589_v28, %v343_v29  ;;  %v587_v29 = vld [vmem:[%s868_s5] ss:$0 sm:$0xff]  ;;  %s697_s5 = smov [#allocation8]  }
 0x1dd   :  { %s515_s15 = sshll.u32 %s697_s5, 4  ;;  %s516_s15 = int_to_ptr.vmem [resolvable:$true] %s515_s15 }
 0x1de   :  { %v345_v33 = vmul.f32 0.5, %v344_v32 }
 0x1e0   :  { %v346_v34 = vsub.f32 1.5, %v345_v33 }
 0x1e2   :  { %v347_v37 = vmul.f32 %v589_v28, %v346_v34 }
 0x1e4   :  { %v351_v39 = vsel %vm350_vm3, %v589_v28, %v347_v37 }
 0x1e5   :  { %v352_v40 = vmul.f32 %v351_v39, %v340_v35 }
 0x1e7   :  { %v354_v43 = vmul.f32 %v352_v40, %v809_v61  ;;  %v820_v44 = vperm.slane %v352_v40, 0 }
 0x1e9   :  { %v355_v45 = vsub.f32 %v353_v41, %v354_v43  ;;  %v359_v48 = vmul.f32 %v820_v44, %v761_v18  ;;  %v365_v49 = vmul.f32 %v820_v44, %v773_v24  ;;  %v372_v50 = vmul.f32 %v820_v44, %v792_v36 }
 0x1ea   :  { %v360_v57 = vmul.f32 %v820_v44, %v763_v19  ;;  %v366_v18 = vmul.f32 %v820_v44, %v777_v26  ;;  %v373_v24 = vmul.f32 %v820_v44, %v800_v42  ;;  %v361_v63 = vmul.f32 %v820_v44, %v765_v20 }
 0x1eb   :  { %v376_v46 = vperm.slane %v355_v45, 0  ;;  %v367_v19 = vmul.f32 %v820_v44, %v784_v30  ;;  %v374_v26 = vmul.f32 %v820_v44, %v806_v47  ;;  %v362_v5 = vmul.f32 %v820_v44, %v767_v21 }
 0x1ec   :  { %v368_v20 = vmul.f32 %v820_v44, %v795_v38  ;;  %v363_v8 = vmul.f32 %v820_v44, %v769_v22  ;;  %v369_v9 = vmul.f32 %v820_v44, %v775_v25  ;;  %v364_v38 = vmul.f32 %v820_v44, %v771_v23 }
 0x1ed   :  { %v378_v51 = vadd.f32 %v376_v46, %v359_v48  ;;  %v384_v52 = vadd.f32 %v376_v46, %v365_v49  ;;  %v391_v53 = vadd.f32 %v376_v46, %v372_v50  ;;  %v379_v58 = vadd.f32 %v376_v46, %v360_v57 }
 0x1ee   :  { %v385_v36 = vadd.f32 %v376_v46, %v366_v18  ;;  %v392_v59 = vadd.f32 %v376_v46, %v373_v24  ;;  %v380_v0 = vadd.f32 %v376_v46, %v361_v63  ;;  %v386_v42 = vadd.f32 %v376_v46, %v367_v19 }
 0x1ef   :  { %v394_v54 = vmax.f32 %v378_v51, 0.0  ;;  %v400_v55 = vmax.f32 %v384_v52, 0.0  ;;  %v407_v56 = vmax.f32 %v391_v53, 0.0  ;;  %v395_v60 = vmax.f32 %v379_v58, 0.0 }
 0x1f0   :  { %v401_v61 = vmax.f32 %v385_v36, 0.0  ;;  %v408_v62 = vmax.f32 %v392_v59, 0.0  ;;  %v393_v1 = vadd.f32 %v376_v46, %v374_v26  ;;  %v396_v2 = vmax.f32 %v380_v0, 0.0 }
 0x1f1   :  { %446 = vmatmul.f32.vlgmr.msra.gmra.mxu1 %v394_v54  ;;  %464 = vmatmul.f32.vlgmr.msra.gmra.mxu2 %v400_v55  ;;  %v402_v3 = vmax.f32 %v386_v42, 0.0  ;;  %v381_v30 = vadd.f32 %v376_v46, %v362_v5  ;;  %v387_v6 = vadd.f32 %v376_v46, %v368_v20  ;;  %v382_v10 = vadd.f32 %v376_v46, %v363_v8 }
 0x1f2   :  { %485 = vmatmul.f32.vlgmr.msrb.gmra.mxu3 %v407_v56  ;;  %v409_v4 = vmax.f32 %v393_v1, 0.0  ;;  %v388_v11 = vadd.f32 %v376_v46, %v369_v9  ;;  %v370_v13 = vmul.f32 %v820_v44, %v779_v27  ;;  %v383_v14 = vadd.f32 %v376_v46, %v364_v38 }
 0x1f3   :  { %v397_v7 = vmax.f32 %v381_v30, 0.0  ;;  %v403_v47 = vmax.f32 %v387_v6, 0.0  ;;  %v398_v12 = vmax.f32 %v382_v10, 0.0  ;;  %v371_v22 = vmul.f32 %v820_v44, %v786_v31 }
 0x1f4   :  { %v404_v21 = vmax.f32 %v388_v11, 0.0  ;;  %v389_v15 = vadd.f32 %v376_v46, %v370_v13  ;;  %v399_v16 = vmax.f32 %v383_v14, 0.0 }
 0x1f5   :  { %v390_v25 = vadd.f32 %v376_v46, %v371_v22 }
 0x1f6   :  { %v405_v17 = vmax.f32 %v389_v15, 0.0 }
 0x1f7   :  { %v406_v28 = vmax.f32 %v390_v25, 0.0 }
 0x1f9   :  { %449 = vmatmul.f32.gmra.mxu1 %v395_v60  ;;  %467 = vmatmul.f32.gmra.mxu2 %v401_v61 }
 0x1fa   :  { %488 = vmatmul.f32.gmra.mxu3 %v408_v62 }
 0x201   :  { %452 = vmatmul.f32.gmra.mxu1 %v396_v2  ;;  %470 = vmatmul.f32.gmra.mxu2 %v402_v3 }
 0x202   :  { %491 = vmatmul.f32.gmra.mxu3 %v409_v4 }
 0x209   :  { %455 = vmatmul.f32.gmra.mxu1 %v397_v7  ;;  %473 = vmatmul.f32.gmra.mxu2 %v403_v47 }
 0x211   :  { %458 = vmatmul.f32.gmra.mxu1 %v398_v12  ;;  %476 = vmatmul.f32.gmra.mxu2 %v404_v21 }
 0x219   :  { %461 = vmatmul.f32.gmra.mxu1 %v399_v16  ;;  %479 = vmatmul.f32.gmra.mxu2 %v405_v17 }
 0x221   :  { %482 = vmatmul.f32.gmra.mxu2 %v406_v28 }
 0x26e   :  { %v447_v23 = vpop.f32.mrf.mxu1 }
 0x26f   :  { %v448_v32 = vadd.f32 %v587_v29, %v447_v23 }
 0x271   :  { %495 = vst [vmem:[#allocation8] sm:$0xff] %v448_v32 }
 0x274   :  { %v465_v27 = vpop.f32.mrf.mxu2 }
 0x275   :  { %v466_v33 = vadd.f32 %v587_v29, %v465_v27  ;;  %v486_v34 = vpop.f32.mrf.mxu3 }
 0x276   :  { %v487_v35 = vadd.f32 %v587_v29, %v486_v34  ;;  %v450_v37 = vpop.f32.mrf.mxu1 }
 0x277   :  { %501 = vst [vmem:[#allocation8 + $0x30] sm:$0xff] %v466_v33  ;;  %v451_v39 = vadd.f32 %v587_v29, %v450_v37 }
 0x278   :  { %508 = vst [vmem:[#allocation8 + $0x68] sm:$0xff] %v487_v35 }
 0x279   :  { %496 = vst [vmem:[#allocation8 + $0x8] sm:$0xff] %v451_v39 }
 0x27c   :  { %v468_v31 = vpop.f32.mrf.mxu2 }
 0x27d   :  { %v469_v40 = vadd.f32 %v587_v29, %v468_v31  ;;  %v489_v41 = vpop.f32.mrf.mxu3 }
 0x27e   :  { %v490_v43 = vadd.f32 %v587_v29, %v489_v41  ;;  %v453_v44 = vpop.f32.mrf.mxu1 }
 0x27f   :  { %502 = vst [vmem:[#allocation8 + $0x38] sm:$0xff] %v469_v40  ;;  %v454_v45 = vadd.f32 %v587_v29, %v453_v44 }
 0x280   :  { %509 = vst [vmem:[#allocation8 + $0x70] sm:$0xff] %v490_v43 }
 0x281   :  { %497 = vst [vmem:[#allocation8 + $0x10] sm:$0xff] %v454_v45 }
 0x284   :  { %v471_v46 = vpop.f32.mrf.mxu2 }
 0x285   :  { %v472_v48 = vadd.f32 %v587_v29, %v471_v46  ;;  %v492_v49 = vpop.f32.mrf.mxu3 }
 0x286   :  { %v493_v50 = vadd.f32 %v587_v29, %v492_v49  ;;  %v456_v51 = vpop.f32.mrf.mxu1 }
 0x287   :  { %503 = vst [vmem:[#allocation8 + $0x40] sm:$0xff] %v472_v48  ;;  %v457_v52 = vadd.f32 %v587_v29, %v456_v51 }
 0x288   :  { %510 = vst [vmem:[#allocation8 + $0x78] sm:$0xff] %v493_v50 }
 0x289   :  { %498 = vst [vmem:[#allocation8 + $0x18] sm:$0xff] %v457_v52 }
 0x28c   :  { %v474_v53 = vpop.f32.mrf.mxu2 }
 0x28d   :  { %v475_v54 = vadd.f32 %v587_v29, %v474_v53 }
 0x28e   :  { %v459_v55 = vpop.f32.mrf.mxu1 }
 0x28f   :  { %504 = vst [vmem:[#allocation8 + $0x48] sm:$0xff] %v475_v54  ;;  %v460_v56 = vadd.f32 %v587_v29, %v459_v55 }
 0x291   :  { %499 = vst [vmem:[#allocation8 + $0x20] sm:$0xff] %v460_v56 }
 0x294   :  { %v477_v57 = vpop.f32.mrf.mxu2 }
 0x295   :  { %v478_v18 = vadd.f32 %v587_v29, %v477_v57 }
 0x296   :  { %v462_v24 = vpop.f32.mrf.mxu1 }
 0x297   :  { %505 = vst [vmem:[#allocation8 + $0x50] sm:$0xff] %v478_v18  ;;  %v463_v58 = vadd.f32 %v587_v29, %v462_v24 }
 0x299   :  { %500 = vst [vmem:[#allocation8 + $0x28] sm:$0xff] %v463_v58 }
 0x29c   :  { %v480_v36 = vpop.f32.mrf.mxu2 }
 0x29d   :  { %v481_v59 = vadd.f32 %v587_v29, %v480_v36 }
 0x29f   :  { %506 = vst [vmem:[#allocation8 + $0x58] sm:$0xff] %v481_v59 }
 0x2a4   :  { %v483_v60 = vpop.f32.mrf.mxu2 }
 0x2a5   :  { %v484_v61 = vadd.f32 %v587_v29, %v483_v60 }
 0x2a7   :  { %507 = vst [vmem:[#allocation8 + $0x60] sm:$0xff] %v484_v61 }
 0x2a8   :  { %523 = dma.vmem_to_hbm [thread:$0]  %s516_s15, 2048, %s518_s18, [#allocation4], %s695_s11, %s695_s11, %s696_s12  }
 0x2a9   :  { %690 = dma.done.wait [#allocation4], 2048  }
 0x2aa   :  { %691 = vsyncadd [#allocation4], 4294965248 }
 0x2ab   :  { %528 = vsyncpa [#allocation3], 1 }
 0x2ac   :  { %529 = vsyncpa [#allocation6], 1 }
 0x2ad   :  { %530 = vsyncpa [#allocation4], 1 }

</bundles_post_ra>
